<compile_context>
chip_gen: v5e
topology: v5e:2x2
jax: 0.10.0
libtpu: 0.0.40
codegen_flags: <defaults>
</compile_context>

<pallas_src>
import jax
import jax.numpy as jnp
from jax.experimental import pallas as pl
from jax.experimental.pallas import tpu as pltpu


# ----------------------------- fused Pallas kernel -------------------------- #

def make_scarf_kernel(batch, n_bn, eps=1e-5):
    """Whole-network kernel.

    Inputs (refs):
      x_ref     : [2*batch, in_dim]  f32  (rows 0..B-1 clean, B..2B-1 corrupted)
      w1_ref    : [in_dim, D]        f32  first bn-block Linear weight
      wslab_ref : [n_bn, D, D]       f32  remaining bn-block weights + final Linear
      vec_ref   : [2*n_bn + 1, D]    f32  rows: gamma_0, beta_0, ..., final bias
      o_ref     : [2*batch, D]       f32  head output for both streams
    """

    def kernel(x_ref, w1_ref, wslab_ref, vec_ref, o_ref):
        h = x_ref[...]  # [2B, in_dim] f32

        def bn_relu(y, gamma, beta):
            # Per-stream BatchNorm1d (training mode, biased var, eps=1e-5):
            # stats over each static half of the stacked batch.
            d = y.shape[-1]
            y3 = y.reshape(2, batch, d)                         # layout no-op (B % 8 == 0)
            mean = jnp.mean(y3, axis=1, keepdims=True)          # [2, 1, D]
            msq = jnp.mean(y3 * y3, axis=1, keepdims=True)
            var = msq - mean * mean                             # E[y^2] - mean^2
            scale = gamma * jax.lax.rsqrt(var + eps)            # gamma folded into scale
            shift = beta - mean * scale                         # beta folded into shift
            # ReLU (Dropout p=0.0 is identity)
            return jnp.maximum(y3 * scale + shift, 0.0).reshape(2 * batch, d)

        # Linear + BN + ReLU blocks (biases of these Linears cancel in BN).
        for li in range(n_bn):
            w = w1_ref[...] if li == 0 else wslab_ref[li - 1]
            y = jnp.dot(h, w, preferred_element_type=jnp.float32)
            gamma = vec_ref[2 * li:2 * li + 1, :]
            beta = vec_ref[2 * li + 1:2 * li + 2, :]
            h = bn_relu(y, gamma, beta)

        # Final plain Linear (+ bias).
        w_last = wslab_ref[n_bn - 1]
        b_last = vec_ref[2 * n_bn:2 * n_bn + 1, :]
        h = jnp.dot(h, w_last, preferred_element_type=jnp.float32) + b_last
        # TODO(synk): dropout > 0.0 (training-time Bernoulli mask) not implemented.

        o_ref[...] = h.astype(o_ref.dtype)

    return kernel


# ------------------------------- parameters --------------------------------- #

def init_scarf_params(key, input_dim, emb_dim, num_hidden, head_depth):
    """PyTorch-default init, then fold + pack into 3 slabs for the kernel."""
    assert num_hidden >= 2 and head_depth >= 2, "folding assumes >=1 bn block per MLP"
    n_bn = (num_hidden - 1) + (head_depth - 1)

    n_linear = num_hidden + head_depth
    keys = jax.random.split(key, n_linear + 1)

    def uniform(k, shape, fan_in):
        bound = 1.0 / jnp.sqrt(jnp.float32(fan_in))
        return jax.random.uniform(k, shape, jnp.float32, -bound, bound)

    ki = 0
    # encoder bn-block Linears (bias dropped: cancels in training-mode BN)
    enc_bn_w = []
    in_dim = input_dim
    for _ in range(num_hidden - 1):
        enc_bn_w.append(uniform(keys[ki], (in_dim, emb_dim), in_dim)); ki += 1
        in_dim = emb_dim
    # encoder final plain Linear (bias dropped: cancels in the head's BN)
    w_enc_last = uniform(keys[ki], (emb_dim, emb_dim), emb_dim); ki += 1
    # head bn-block Linears (bias dropped)
    head_bn_w = []
    for _ in range(head_depth - 1):
        head_bn_w.append(uniform(keys[ki], (emb_dim, emb_dim), emb_dim)); ki += 1
    # head final plain Linear (+ bias, kept)
    w_head_last = uniform(keys[ki], (emb_dim, emb_dim), emb_dim); ki += 1
    b_head_last = uniform(keys[ki], (1, emb_dim), emb_dim); ki += 1

    # Fold encoder's final Linear into the head's first bn-block Linear.
    head_bn_w[0] = jnp.dot(w_enc_last, head_bn_w[0],
                           preferred_element_type=jnp.float32)

    bn_ws = enc_bn_w + head_bn_w                     # length n_bn (first has din=input_dim)
    w_first = bn_ws[0]                               # [input_dim, emb_dim]
    w_slab = jnp.stack(bn_ws[1:] + [w_head_last], axis=0)   # [n_bn, D, D]

    # Vector slab rows: gamma_i, beta_i for each bn layer, then final bias.
    rows = []
    for _ in range(n_bn):
        rows.append(jnp.ones((1, emb_dim), jnp.float32))     # gamma
        rows.append(jnp.zeros((1, emb_dim), jnp.float32))    # beta
    rows.append(b_head_last)
    vec_slab = jnp.concatenate(rows, axis=0)                 # [2*n_bn + 1, D]

    return dict(w_first=w_first, w_slab=w_slab, vec_slab=vec_slab, n_bn=n_bn)


# ------------------------------- SCARF forward ------------------------------ #

def scarf_forward(x, params, features_low, features_high, corruption_len, key):
    B, m = x.shape

    # ---- corruption glue (plain XLA, fuses for free):
    # per-row "randperm(m)[:c]" mask via argsort-of-uniforms, Uniform marginals.
    kperm, kunif = jax.random.split(key)
    noise = jax.random.uniform(kperm, (B, m), jnp.float32)
    ranks = jnp.argsort(jnp.argsort(noise, axis=-1), axis=-1)
    mask = ranks < corruption_len                             # exactly c True per row
    u = jax.random.uniform(kunif, (B, m), jnp.float32)
    x_random = u * (features_high - features_low)[None, :] + features_low[None, :]
    x_corrupted = jnp.where(mask, x_random, x)
    x_both = jnp.concatenate([x, x_corrupted], axis=0)        # [2B, m]

    w_first = params["w_first"]
    w_slab = params["w_slab"]
    vec_slab = params["vec_slab"]
    n_bn = params["n_bn"]
    D = w_slab.shape[-1]

    # ---- advisory cost estimate for the XLA scheduler
    flops = 2 * (2 * B) * m * D + n_bn * 2 * (2 * B) * D * D
    bytes_accessed = int(x_both.nbytes + w_first.nbytes + w_slab.nbytes
                         + vec_slab.nbytes + 2 * B * D * 4)

    out = pl.pallas_call(
        make_scarf_kernel(B, n_bn),
        out_shape=jax.ShapeDtypeStruct((2 * B, D), jnp.float32),
        in_specs=[pl.BlockSpec(memory_space=pltpu.MemorySpace.VMEM)] * 4,
        out_specs=pl.BlockSpec(memory_space=pltpu.MemorySpace.VMEM),
        cost_estimate=pl.CostEstimate(flops=int(flops),
                                      transcendentals=int(n_bn * D),
                                      bytes_accessed=bytes_accessed),
    )(x_both, w_first, w_slab, vec_slab)

    embeddings = out[:B]
    embeddings_corrupted = out[B:]
    return embeddings, embeddings_corrupted


# ---------------------------------- main ------------------------------------ #

if __name__ == "__main__":
    # small, deterministic config (batch multiple of 8 keeps the per-stream
    # reshape a pure-layout no-op on the sublane axis)
    batch = 8
    input_dim = 16
    emb_dim = 32
    num_hidden = 4
    head_depth = 2
    corruption_rate = 0.6
    corruption_len = int(corruption_rate * input_dim)   # = 9

    key = jax.random.PRNGKey(0)
    k_x, k_params, k_corrupt = jax.random.split(key, 3)

    x = jax.random.normal(k_x, (batch, input_dim), jnp.float32)
    features_low = jnp.zeros((input_dim,), jnp.float32)
    features_high = jnp.ones((input_dim,), jnp.float32)

    params = init_scarf_params(k_params, input_dim, emb_dim, num_hidden, head_depth)

    emb, emb_corrupted = scarf_forward(
        x, params, features_low, features_high, corruption_len, k_corrupt)

    jax.block_until_ready(emb)
    jax.block_until_ready(emb_corrupted)

    assert emb.shape == (batch, emb_dim)
    assert emb_corrupted.shape == (batch, emb_dim)
    print("KERNEL_OK")
</pallas_src>

<mosaic_0001>
module attributes {stable_mosaic.version = 11 : i64} {
  func.func @kernel(%arg0: memref<16x16xf32, #tpu.memory_space<vmem>>, %arg1: memref<16x32xf32, #tpu.memory_space<vmem>>, %arg2: memref<4x32x32xf32, #tpu.memory_space<vmem>>, %arg3: memref<9x32xf32, #tpu.memory_space<vmem>>, %arg4: memref<16x32xf32, #tpu.memory_space<vmem>>) attributes {dimension_semantics = [], scalar_prefetch = 0 : i64, scratch_operands = 0 : i64, tpu.core_type = #tpu.core_type<tc>} {
    %c0 = arith.constant 0 : index
    %c0_0 = arith.constant 0 : index
    %0 = vector.load %arg0[%c0, %c0_0] : memref<16x16xf32, #tpu.memory_space<vmem>>, vector<16x16xf32>
    %c0_1 = arith.constant 0 : index
    %c0_2 = arith.constant 0 : index
    %1 = vector.load %arg1[%c0_1, %c0_2] : memref<16x32xf32, #tpu.memory_space<vmem>>, vector<16x32xf32>
    %cst = arith.constant dense<0.000000e+00> : vector<16x32xf32>
    %2 = tpu.matmul %0, %1, %cst {dimension_numbers = #tpu.dot_dimension_numbers<[1], [0], [0], [1], [0, 0, 1, 1], [], []>} : vector<16x16xf32>, vector<16x32xf32>, vector<16x32xf32> -> vector<16x32xf32>
    %c0_3 = arith.constant 0 : index
    %c0_4 = arith.constant 0 : index
    %3 = vector.load %arg3[%c0_3, %c0_4] : memref<9x32xf32, #tpu.memory_space<vmem>>, vector<1x32xf32>
    %c1 = arith.constant 1 : index
    %c0_5 = arith.constant 0 : index
    %4 = vector.load %arg3[%c1, %c0_5] : memref<9x32xf32, #tpu.memory_space<vmem>>, vector<1x32xf32>
    %5 = vector.shape_cast %2 : vector<16x32xf32> to vector<2x8x32xf32>
    %cst_6 = arith.constant dense<0.000000e+00> : vector<2x32xf32>
    %6 = vector.multi_reduction <add>, %5, %cst_6 [1] : vector<2x8x32xf32> to vector<2x32xf32>
    %7 = vector.shape_cast %6 : vector<2x32xf32> to vector<2x1x32xf32>
    %cst_7 = arith.constant 8.000000e+00 : f32
    %8 = vector.broadcast %cst_7 : f32 to vector<2x1x32xf32>
    %9 = arith.divf %7, %8 : vector<2x1x32xf32>
    %10 = arith.mulf %5, %5 : vector<2x8x32xf32>
    %cst_8 = arith.constant dense<0.000000e+00> : vector<2x32xf32>
    %11 = vector.multi_reduction <add>, %10, %cst_8 [1] : vector<2x8x32xf32> to vector<2x32xf32>
    %12 = vector.shape_cast %11 : vector<2x32xf32> to vector<2x1x32xf32>
    %cst_9 = arith.constant 8.000000e+00 : f32
    %13 = vector.broadcast %cst_9 : f32 to vector<2x1x32xf32>
    %14 = arith.divf %12, %13 : vector<2x1x32xf32>
    %15 = arith.mulf %9, %9 : vector<2x1x32xf32>
    %16 = arith.subf %14, %15 : vector<2x1x32xf32>
    %cst_10 = arith.constant 9.99999974E-6 : f32
    %17 = vector.broadcast %cst_10 : f32 to vector<2x1x32xf32>
    %18 = arith.addf %16, %17 : vector<2x1x32xf32>
    %19 = math.rsqrt %18 : vector<2x1x32xf32>
    %20 = vector.shape_cast %3 : vector<1x32xf32> to vector<1x1x32xf32>
    %21 = vector.broadcast %20 : vector<1x1x32xf32> to vector<2x1x32xf32>
    %22 = arith.mulf %21, %19 : vector<2x1x32xf32>
    %23 = arith.mulf %9, %22 : vector<2x1x32xf32>
    %24 = vector.shape_cast %4 : vector<1x32xf32> to vector<1x1x32xf32>
    %25 = vector.broadcast %24 : vector<1x1x32xf32> to vector<2x1x32xf32>
    %26 = arith.subf %25, %23 : vector<2x1x32xf32>
    %27 = vector.broadcast %22 : vector<2x1x32xf32> to vector<2x8x32xf32>
    %28 = arith.mulf %5, %27 : vector<2x8x32xf32>
    %29 = vector.broadcast %26 : vector<2x1x32xf32> to vector<2x8x32xf32>
    %30 = arith.addf %28, %29 : vector<2x8x32xf32>
    %cst_11 = arith.constant 0.000000e+00 : f32
    %31 = vector.broadcast %cst_11 : f32 to vector<2x8x32xf32>
    %32 = arith.maximumf %30, %31 : vector<2x8x32xf32>
    %33 = vector.shape_cast %32 : vector<2x8x32xf32> to vector<16x32xf32>
    %c0_12 = arith.constant 0 : index
    %c0_13 = arith.constant 0 : index
    %c0_14 = arith.constant 0 : index
    %34 = vector.load %arg2[%c0_12, %c0_13, %c0_14] : memref<4x32x32xf32, #tpu.memory_space<vmem>>, vector<1x32x32xf32>
    %35 = vector.shape_cast %34 : vector<1x32x32xf32> to vector<32x32xf32>
    %cst_15 = arith.constant dense<0.000000e+00> : vector<16x32xf32>
    %36 = tpu.matmul %33, %35, %cst_15 {dimension_numbers = #tpu.dot_dimension_numbers<[1], [0], [0], [1], [0, 0, 1, 1], [], []>} : vector<16x32xf32>, vector<32x32xf32>, vector<16x32xf32> -> vector<16x32xf32>
    %c2 = arith.constant 2 : index
    %c0_16 = arith.constant 0 : index
    %37 = vector.load %arg3[%c2, %c0_16] : memref<9x32xf32, #tpu.memory_space<vmem>>, vector<1x32xf32>
    %c3 = arith.constant 3 : index
    %c0_17 = arith.constant 0 : index
    %38 = vector.load %arg3[%c3, %c0_17] : memref<9x32xf32, #tpu.memory_space<vmem>>, vector<1x32xf32>
    %39 = vector.shape_cast %36 : vector<16x32xf32> to vector<2x8x32xf32>
    %cst_18 = arith.constant dense<0.000000e+00> : vector<2x32xf32>
    %40 = vector.multi_reduction <add>, %39, %cst_18 [1] : vector<2x8x32xf32> to vector<2x32xf32>
    %41 = vector.shape_cast %40 : vector<2x32xf32> to vector<2x1x32xf32>
    %cst_19 = arith.constant 8.000000e+00 : f32
    %42 = vector.broadcast %cst_19 : f32 to vector<2x1x32xf32>
    %43 = arith.divf %41, %42 : vector<2x1x32xf32>
    %44 = arith.mulf %39, %39 : vector<2x8x32xf32>
    %cst_20 = arith.constant dense<0.000000e+00> : vector<2x32xf32>
    %45 = vector.multi_reduction <add>, %44, %cst_20 [1] : vector<2x8x32xf32> to vector<2x32xf32>
    %46 = vector.shape_cast %45 : vector<2x32xf32> to vector<2x1x32xf32>
    %cst_21 = arith.constant 8.000000e+00 : f32
    %47 = vector.broadcast %cst_21 : f32 to vector<2x1x32xf32>
    %48 = arith.divf %46, %47 : vector<2x1x32xf32>
    %49 = arith.mulf %43, %43 : vector<2x1x32xf32>
    %50 = arith.subf %48, %49 : vector<2x1x32xf32>
    %cst_22 = arith.constant 9.99999974E-6 : f32
    %51 = vector.broadcast %cst_22 : f32 to vector<2x1x32xf32>
    %52 = arith.addf %50, %51 : vector<2x1x32xf32>
    %53 = math.rsqrt %52 : vector<2x1x32xf32>
    %54 = vector.shape_cast %37 : vector<1x32xf32> to vector<1x1x32xf32>
    %55 = vector.broadcast %54 : vector<1x1x32xf32> to vector<2x1x32xf32>
    %56 = arith.mulf %55, %53 : vector<2x1x32xf32>
    %57 = arith.mulf %43, %56 : vector<2x1x32xf32>
    %58 = vector.shape_cast %38 : vector<1x32xf32> to vector<1x1x32xf32>
    %59 = vector.broadcast %58 : vector<1x1x32xf32> to vector<2x1x32xf32>
    %60 = arith.subf %59, %57 : vector<2x1x32xf32>
    %61 = vector.broadcast %56 : vector<2x1x32xf32> to vector<2x8x32xf32>
    %62 = arith.mulf %39, %61 : vector<2x8x32xf32>
    %63 = vector.broadcast %60 : vector<2x1x32xf32> to vector<2x8x32xf32>
    %64 = arith.addf %62, %63 : vector<2x8x32xf32>
    %cst_23 = arith.constant 0.000000e+00 : f32
    %65 = vector.broadcast %cst_23 : f32 to vector<2x8x32xf32>
    %66 = arith.maximumf %64, %65 : vector<2x8x32xf32>
    %67 = vector.shape_cast %66 : vector<2x8x32xf32> to vector<16x32xf32>
    %c1_24 = arith.constant 1 : index
    %c0_25 = arith.constant 0 : index
    %c0_26 = arith.constant 0 : index
    %68 = vector.load %arg2[%c1_24, %c0_25, %c0_26] : memref<4x32x32xf32, #tpu.memory_space<vmem>>, vector<1x32x32xf32>
    %69 = vector.shape_cast %68 : vector<1x32x32xf32> to vector<32x32xf32>
    %cst_27 = arith.constant dense<0.000000e+00> : vector<16x32xf32>
    %70 = tpu.matmul %67, %69, %cst_27 {dimension_numbers = #tpu.dot_dimension_numbers<[1], [0], [0], [1], [0, 0, 1, 1], [], []>} : vector<16x32xf32>, vector<32x32xf32>, vector<16x32xf32> -> vector<16x32xf32>
    %c4 = arith.constant 4 : index
    %c0_28 = arith.constant 0 : index
    %71 = vector.load %arg3[%c4, %c0_28] : memref<9x32xf32, #tpu.memory_space<vmem>>, vector<1x32xf32>
    %c5 = arith.constant 5 : index
    %c0_29 = arith.constant 0 : index
    %72 = vector.load %arg3[%c5, %c0_29] : memref<9x32xf32, #tpu.memory_space<vmem>>, vector<1x32xf32>
    %73 = vector.shape_cast %70 : vector<16x32xf32> to vector<2x8x32xf32>
    %cst_30 = arith.constant dense<0.000000e+00> : vector<2x32xf32>
    %74 = vector.multi_reduction <add>, %73, %cst_30 [1] : vector<2x8x32xf32> to vector<2x32xf32>
    %75 = vector.shape_cast %74 : vector<2x32xf32> to vector<2x1x32xf32>
    %cst_31 = arith.constant 8.000000e+00 : f32
    %76 = vector.broadcast %cst_31 : f32 to vector<2x1x32xf32>
    %77 = arith.divf %75, %76 : vector<2x1x32xf32>
    %78 = arith.mulf %73, %73 : vector<2x8x32xf32>
    %cst_32 = arith.constant dense<0.000000e+00> : vector<2x32xf32>
    %79 = vector.multi_reduction <add>, %78, %cst_32 [1] : vector<2x8x32xf32> to vector<2x32xf32>
    %80 = vector.shape_cast %79 : vector<2x32xf32> to vector<2x1x32xf32>
    %cst_33 = arith.constant 8.000000e+00 : f32
    %81 = vector.broadcast %cst_33 : f32 to vector<2x1x32xf32>
    %82 = arith.divf %80, %81 : vector<2x1x32xf32>
    %83 = arith.mulf %77, %77 : vector<2x1x32xf32>
    %84 = arith.subf %82, %83 : vector<2x1x32xf32>
    %cst_34 = arith.constant 9.99999974E-6 : f32
    %85 = vector.broadcast %cst_34 : f32 to vector<2x1x32xf32>
    %86 = arith.addf %84, %85 : vector<2x1x32xf32>
    %87 = math.rsqrt %86 : vector<2x1x32xf32>
    %88 = vector.shape_cast %71 : vector<1x32xf32> to vector<1x1x32xf32>
    %89 = vector.broadcast %88 : vector<1x1x32xf32> to vector<2x1x32xf32>
    %90 = arith.mulf %89, %87 : vector<2x1x32xf32>
    %91 = arith.mulf %77, %90 : vector<2x1x32xf32>
    %92 = vector.shape_cast %72 : vector<1x32xf32> to vector<1x1x32xf32>
    %93 = vector.broadcast %92 : vector<1x1x32xf32> to vector<2x1x32xf32>
    %94 = arith.subf %93, %91 : vector<2x1x32xf32>
    %95 = vector.broadcast %90 : vector<2x1x32xf32> to vector<2x8x32xf32>
    %96 = arith.mulf %73, %95 : vector<2x8x32xf32>
    %97 = vector.broadcast %94 : vector<2x1x32xf32> to vector<2x8x32xf32>
    %98 = arith.addf %96, %97 : vector<2x8x32xf32>
    %cst_35 = arith.constant 0.000000e+00 : f32
    %99 = vector.broadcast %cst_35 : f32 to vector<2x8x32xf32>
    %100 = arith.maximumf %98, %99 : vector<2x8x32xf32>
    %101 = vector.shape_cast %100 : vector<2x8x32xf32> to vector<16x32xf32>
    %c2_36 = arith.constant 2 : index
    %c0_37 = arith.constant 0 : index
    %c0_38 = arith.constant 0 : index
    %102 = vector.load %arg2[%c2_36, %c0_37, %c0_38] : memref<4x32x32xf32, #tpu.memory_space<vmem>>, vector<1x32x32xf32>
    %103 = vector.shape_cast %102 : vector<1x32x32xf32> to vector<32x32xf32>
    %cst_39 = arith.constant dense<0.000000e+00> : vector<16x32xf32>
    %104 = tpu.matmul %101, %103, %cst_39 {dimension_numbers = #tpu.dot_dimension_numbers<[1], [0], [0], [1], [0, 0, 1, 1], [], []>} : vector<16x32xf32>, vector<32x32xf32>, vector<16x32xf32> -> vector<16x32xf32>
    %c6 = arith.constant 6 : index
    %c0_40 = arith.constant 0 : index
    %105 = vector.load %arg3[%c6, %c0_40] : memref<9x32xf32, #tpu.memory_space<vmem>>, vector<1x32xf32>
    %c7 = arith.constant 7 : index
    %c0_41 = arith.constant 0 : index
    %106 = vector.load %arg3[%c7, %c0_41] : memref<9x32xf32, #tpu.memory_space<vmem>>, vector<1x32xf32>
    %107 = vector.shape_cast %104 : vector<16x32xf32> to vector<2x8x32xf32>
    %cst_42 = arith.constant dense<0.000000e+00> : vector<2x32xf32>
    %108 = vector.multi_reduction <add>, %107, %cst_42 [1] : vector<2x8x32xf32> to vector<2x32xf32>
    %109 = vector.shape_cast %108 : vector<2x32xf32> to vector<2x1x32xf32>
    %cst_43 = arith.constant 8.000000e+00 : f32
    %110 = vector.broadcast %cst_43 : f32 to vector<2x1x32xf32>
    %111 = arith.divf %109, %110 : vector<2x1x32xf32>
    %112 = arith.mulf %107, %107 : vector<2x8x32xf32>
    %cst_44 = arith.constant dense<0.000000e+00> : vector<2x32xf32>
    %113 = vector.multi_reduction <add>, %112, %cst_44 [1] : vector<2x8x32xf32> to vector<2x32xf32>
    %114 = vector.shape_cast %113 : vector<2x32xf32> to vector<2x1x32xf32>
    %cst_45 = arith.constant 8.000000e+00 : f32
    %115 = vector.broadcast %cst_45 : f32 to vector<2x1x32xf32>
    %116 = arith.divf %114, %115 : vector<2x1x32xf32>
    %117 = arith.mulf %111, %111 : vector<2x1x32xf32>
    %118 = arith.subf %116, %117 : vector<2x1x32xf32>
    %cst_46 = arith.constant 9.99999974E-6 : f32
    %119 = vector.broadcast %cst_46 : f32 to vector<2x1x32xf32>
    %120 = arith.addf %118, %119 : vector<2x1x32xf32>
    %121 = math.rsqrt %120 : vector<2x1x32xf32>
    %122 = vector.shape_cast %105 : vector<1x32xf32> to vector<1x1x32xf32>
    %123 = vector.broadcast %122 : vector<1x1x32xf32> to vector<2x1x32xf32>
    %124 = arith.mulf %123, %121 : vector<2x1x32xf32>
    %125 = arith.mulf %111, %124 : vector<2x1x32xf32>
    %126 = vector.shape_cast %106 : vector<1x32xf32> to vector<1x1x32xf32>
    %127 = vector.broadcast %126 : vector<1x1x32xf32> to vector<2x1x32xf32>
    %128 = arith.subf %127, %125 : vector<2x1x32xf32>
    %129 = vector.broadcast %124 : vector<2x1x32xf32> to vector<2x8x32xf32>
    %130 = arith.mulf %107, %129 : vector<2x8x32xf32>
    %131 = vector.broadcast %128 : vector<2x1x32xf32> to vector<2x8x32xf32>
    %132 = arith.addf %130, %131 : vector<2x8x32xf32>
    %cst_47 = arith.constant 0.000000e+00 : f32
    %133 = vector.broadcast %cst_47 : f32 to vector<2x8x32xf32>
    %134 = arith.maximumf %132, %133 : vector<2x8x32xf32>
    %135 = vector.shape_cast %134 : vector<2x8x32xf32> to vector<16x32xf32>
    %c3_48 = arith.constant 3 : index
    %c0_49 = arith.constant 0 : index
    %c0_50 = arith.constant 0 : index
    %136 = vector.load %arg2[%c3_48, %c0_49, %c0_50] : memref<4x32x32xf32, #tpu.memory_space<vmem>>, vector<1x32x32xf32>
    %137 = vector.shape_cast %136 : vector<1x32x32xf32> to vector<32x32xf32>
    %c8 = arith.constant 8 : index
    %c0_51 = arith.constant 0 : index
    %138 = vector.load %arg3[%c8, %c0_51] : memref<9x32xf32, #tpu.memory_space<vmem>>, vector<1x32xf32>
    %cst_52 = arith.constant dense<0.000000e+00> : vector<16x32xf32>
    %139 = tpu.matmul %135, %137, %cst_52 {dimension_numbers = #tpu.dot_dimension_numbers<[1], [0], [0], [1], [0, 0, 1, 1], [], []>} : vector<16x32xf32>, vector<32x32xf32>, vector<16x32xf32> -> vector<16x32xf32>
    %140 = vector.broadcast %138 : vector<1x32xf32> to vector<16x32xf32>
    %141 = arith.addf %139, %140 : vector<16x32xf32>
    %c0_53 = arith.constant 0 : index
    %c0_54 = arith.constant 0 : index
    %142 = vector.load %arg4[%c0_53, %c0_54] : memref<16x32xf32, #tpu.memory_space<vmem>>, vector<16x32xf32>
    tpu.vector_store %arg4[%c0_53, %c0_54], %141 {strides = array<i32>} : memref<16x32xf32, #tpu.memory_space<vmem>>, vector<16x32xf32>,
    return
  }
}

</mosaic_0001>

<bundles_post_ra>
// kernel: tpu_custom_call.1
= control target key start
LH: loop header
LB: loop body
LE: loop exit
PB: predicated region body
PF: predicated region fallthrough
CT: control target
= control target key end

     0   :  { %9 = vsyncpa [#allocation3], 0  ;;  %s917_s0 = inlined_call_operand.hbm [shape: f32[16,16], index: 0, kind: input, shape index: {}]   ;;  %s918_s1 = inlined_call_operand.hbm [shape: f32[16,32], index: 1, kind: input, shape index: {}]   ;;  %s919_s2 = inlined_call_operand.hbm [shape: f32[4,32,32], index: 2, kind: input, shape index: {}]   ;;  %s920_s3 = inlined_call_operand.hbm [shape: f32[9,32], index: 3, kind: input, shape index: {}]   ;;  %s921_s4 = inlined_call_operand.hbm [shape: f32[16,32], index: 4, kind: output, shape index: {}]  }
   0x1   :  { %10 = vsyncpa [#allocation6], 0 }
   0x2   :  { %11 = vsyncpa [#allocation9], 0 }
   0x3   :  { %12 = vsyncpa [#allocation4], 0  ;;  %s30_s17 = sshll.u32 %s918_s1, 4  ;;  %s762_s18 = smov [#allocation5]   ;;  %s31_s17 = int_to_ptr.hbm [resolvable:$true] %s30_s17 }
   0x4   :  { %s32_s19 = sshll.u32 %s762_s18, 4  ;;  %s17_s22 = sshll.u32 %s917_s0, 4  ;;  %s33_s19 = int_to_ptr.vmem [resolvable:$true] %s32_s19  ;;  %s18_s22 = int_to_ptr.hbm [resolvable:$true] %s17_s22 }
   0x5   :  { %s763_s23 = smov 128   ;;  %s764_s24 = smov 8  }
   0x6   :  { %38 = dma.hbm_to_vmem [thread:$0]  %s31_s17, 256, %s33_s19, [#allocation6], %s763_s23, %s763_s23, %s764_s24  }
   0x7   :  { %s765_s25 = smov [#allocation2]   ;;  %s43_s1 = sshll.u32 %s919_s2, 4  ;;  %s44_s1 = int_to_ptr.hbm [resolvable:$true] %s43_s1 }
   0x8   :  { %s19_s26 = sshll.u32 %s765_s25, 4  ;;  %s56_s30 = sshll.u32 %s920_s3, 4  ;;  %s20_s26 = int_to_ptr.vmem [resolvable:$true] %s19_s26  ;;  %s57_s30 = int_to_ptr.hbm [resolvable:$true] %s56_s30 }
   0x9   :  { %25 = dma.hbm_to_vmem [thread:$0]  %s18_s22, 256, %s20_s26, [#allocation3], %s763_s23, %s763_s23, %s764_s24  }
   0xa   :  { %s766_s5 = smov [#allocation7]   ;;  %s767_s7 = smov [#allocation8]  }
   0xb   :  { %s45_s6 = sshll.u32 %s766_s5, 4  ;;  %s58_s2 = sshll.u32 %s767_s7, 4  ;;  %s46_s6 = int_to_ptr.vmem [resolvable:$true] %s45_s6  ;;  %s59_s2 = int_to_ptr.vmem [resolvable:$true] %s58_s2 }
   0xc   :  { %51 = dma.hbm_to_vmem [thread:$0]  %s44_s1, 2048, %s46_s6, [#allocation6], %s763_s23, %s763_s23, %s764_s24  }
   0xd   :  { %64 = dma.hbm_to_vmem [thread:$0]  %s57_s30, 256, %s59_s2, [#allocation9], %s763_s23, %s763_s23, %s764_s24  }
   0xe   :  { %754 = dma.done.wait [#allocation3], 256  }
   0xf   :  { %755 = vsyncadd [#allocation3], 4294967040 }
  0x10   :  { %756 = dma.done.wait [#allocation6], 2304  }
  0x11   :  { %757 = vsyncadd [#allocation6], 4294964992 }
  0x12   :  { %758 = dma.done.wait [#allocation9], 256  }
  0x13   :  { %759 = vsyncadd [#allocation9], 4294967040  ;;  %v84_v0 = vld [vmem:[#allocation5 + $0x8] sm:$0xff]  ;;  %v83_v1 = vld [vmem:[#allocation5] sm:$0xff]  ;;  %vm85_vm0 = vcmask 130048   ;;  %v768_v4 = vmov 8.0  }
  0x14   :  { %106 = vmatpush.msra.mxu0 %v84_v0  ;;  %605 = vmatpush.msra.mxu1 %v84_v0  ;;  %v81_v2 = vld [vmem:[#allocation2] sm:$0xff]  ;;  %v82_v3 = vld [vmem:[#allocation2 + $0x8] sm:$0xff]  ;;  %616 = vrcp.f32 %v768_v4  ;;  %vm117_vm1 = vcmask 261120   ;;  %v204_v41 = vld [vmem:[#allocation7 + $0x18] sm:$0xff]  ;;  %s769_s3 = smov [#allocation10]   ;;  %s580_s11 = sshll.u32 %s921_s4, 4  ;;  %s581_s11 = int_to_ptr.hbm [resolvable:$true] %s580_s11 }
  0x15   :  { %v203_v46 = vld [vmem:[#allocation7 + $0x10] sm:$0xff]  ;;  %v202_v51 = vld [vmem:[#allocation7 + $0x8] sm:$0xff]  ;;  %v201_v54 = vld [vmem:[#allocation7] sm:$0xff]  ;;  %s578_s8 = sshll.u32 %s769_s3, 4  ;;  %s579_s8 = int_to_ptr.vmem [resolvable:$true] %s578_s8 }
  0x16   :  { %107 = vmatpush.msra.mxu0 %v83_v1  ;;  %606 = vmatpush.msra.mxu1 %v83_v1 }
  0x17   :  { %595 = vmatmul.msk.f32.vlgmr.msra.gmra.mxu0 %vm85_vm0, %v81_v2  ;;  %596 = vmatmul.msk.f32.vlgmr.msra.gmra.mxu1 %vm85_vm0, %v82_v3  ;;  %v115_v3 = vld [vmem:[#allocation8] sm:$0x1] }
  0x18   :  { %223 = vmatpush.msrb.mxu1 %v204_v41 }
  0x1a   :  { %v617_v5 = vpop.eup %616  ;;  %224 = vmatpush.msrb.mxu1 %v203_v46 }
  0x1b   :  { %v133_v6 = vmul.f32 8.0, %v617_v5  ;;  %vm137_vm2 = vweird.f32 %v617_v5 }
  0x1c   :  { %225 = vmatpush.msrb.mxu1 %v202_v51 }
  0x1d   :  { %v134_v7 = vsub.f32 1.0, %v133_v6 }
  0x1e   :  { %226 = vmatpush.msrb.mxu1 %v201_v54 }
  0x1f   :  { %v135_v16 = vmul.f32 %v617_v5, %v134_v7 }
  0x21   :  { %v136_v27 = vadd.f32 %v617_v5, %v135_v16 }
  0x23   :  { %v833_v36 = vsel %vm137_vm2, %v617_v5, %v136_v27 }
  0x94   :  { %v819_v8 = vpop.f32.mrf.mxu0  ;;  %v821_v9 = vpop.f32.mrf.mxu1 }
  0x95   :  { %v118_v10 = vsel %vm117_vm1, %v819_v8, 0.0  ;;  %v141_v11 = vmul.f32 %v819_v8, %v819_v8  ;;  %v125_v12 = vsel %vm117_vm1, %v821_v9, 0.0  ;;  %v142_v13 = vmul.f32 %v821_v9, %v821_v9 }
  0x96   :  { %v119_v14 = vrot.slane %v118_v10, 4  ;;  %v126_v15 = vrot.slane %v125_v12, 4 }
  0x97   :  { %v143_v17 = vsel %vm117_vm1, %v141_v11, 0.0  ;;  %v150_v18 = vsel %vm117_vm1, %v142_v13, 0.0  ;;  %v116_v11 = vld [vmem:[#allocation8 + $0x1] sm:$0x1] }
  0x98   :  { %v120_v19 = vadd.f32 %v119_v14, %v118_v10  ;;  %v144_v20 = vrot.slane %v143_v17, 4  ;;  %v127_v21 = vadd.f32 %v126_v15, %v125_v12  ;;  %v151_v22 = vrot.slane %v150_v18, 4 }
  0x9a   :  { %v121_v23 = vrot.slane %v120_v19, 2  ;;  %v145_v24 = vadd.f32 %v144_v20, %v143_v17  ;;  %v128_v25 = vrot.slane %v127_v21, 2  ;;  %v152_v26 = vadd.f32 %v151_v22, %v150_v18 }
  0x9c   :  { %v122_v28 = vadd.f32 %v121_v23, %v120_v19  ;;  %v146_v29 = vrot.slane %v145_v24, 2  ;;  %v129_v30 = vadd.f32 %v128_v25, %v127_v21  ;;  %v153_v31 = vrot.slane %v152_v26, 2 }
  0x9e   :  { %v123_v32 = vrot.slane %v122_v28, 1  ;;  %v147_v33 = vadd.f32 %v146_v29, %v145_v24  ;;  %v130_v34 = vrot.slane %v129_v30, 1  ;;  %v154_v35 = vadd.f32 %v153_v31, %v152_v26 }
  0xa0   :  { %v124_v37 = vadd.f32 %v123_v32, %v122_v28  ;;  %v148_v38 = vrot.slane %v147_v33, 1  ;;  %v131_v39 = vadd.f32 %v130_v34, %v129_v30  ;;  %v155_v40 = vrot.slane %v154_v35, 1 }
  0xa2   :  { %v139_v42 = vmul.f32 %v833_v36, %v124_v37  ;;  %v149_v43 = vadd.f32 %v148_v38, %v147_v33  ;;  %v140_v44 = vmul.f32 %v833_v36, %v131_v39  ;;  %v156_v45 = vadd.f32 %v155_v40, %v154_v35 }
  0xa4   :  { %v157_v47 = vmul.f32 %v149_v43, %v833_v36  ;;  %v159_v48 = vmul.f32 %v139_v42, %v139_v42  ;;  %v158_v49 = vmul.f32 %v156_v45, %v833_v36  ;;  %v160_v50 = vmul.f32 %v140_v44, %v140_v44 }
  0xa6   :  { %v161_v52 = vsub.f32 %v157_v47, %v159_v48  ;;  %v162_v53 = vsub.f32 %v158_v49, %v160_v50  ;;  %v316_v48 = vld [vmem:[#allocation7 + $0x38] sm:$0xff] }
  0xa7   :  { %335 = vmatpush.msra.mxu2 %v316_v48 }
  0xa8   :  { %v163_v55 = vadd.f32 1e-05, %v161_v52  ;;  %v164_v56 = vadd.f32 1e-05, %v162_v53  ;;  %v315_v53 = vld [vmem:[#allocation7 + $0x30] sm:$0xff] }
  0xa9   :  { %336 = vmatpush.msra.mxu2 %v315_v53 }
  0xaa   :  { %618 = vrsqrt.f32 %v163_v55  ;;  %vm171_vm5 = vweird.f32 %v163_v55  ;;  %vm181_vm7 = vweird.f32 %v164_v56 }
  0xab   :  { %620 = vrsqrt.f32 %v164_v56 }
  0xb0   :  { %v619_v57 = vpop.eup %618 }
  0xb1   :  { %v621_v58 = vpop.eup %620  ;;  %v166_v59 = vmul.f32 %v619_v57, %v163_v55  ;;  %vm172_vm3 = vweird.f32 %v619_v57 }
  0xb2   :  { %v176_v60 = vmul.f32 %v621_v58, %v164_v56  ;;  %vm182_vm4 = vweird.f32 %v621_v58  ;;  %vm173_vm6 = vmor %vm171_vm5, %vm172_vm3 }
  0xb3   :  { %v167_v61 = vmul.f32 %v619_v57, %v166_v59  ;;  %vm183_vm8 = vmor %vm181_vm7, %vm182_vm4 }
  0xb4   :  { %v177_v62 = vmul.f32 %v621_v58, %v176_v60 }
  0xb5   :  { %v168_v63 = vmul.f32 0.5, %v167_v61 }
  0xb6   :  { %v178_v0 = vmul.f32 0.5, %v177_v62  ;;  %v313_v62 = vld [vmem:[#allocation7 + $0x20] sm:$0xff] }
  0xb7   :  { %v169_v1 = vsub.f32 1.5, %v168_v63 }
  0xb8   :  { %v179_v2 = vsub.f32 1.5, %v178_v0 }
  0xb9   :  { %v170_v4 = vmul.f32 %v619_v57, %v169_v1 }
  0xba   :  { %v180_v5 = vmul.f32 %v621_v58, %v179_v2 }
  0xbb   :  { %v174_v6 = vsel %vm173_vm6, %v619_v57, %v170_v4 }
  0xbc   :  { %v185_v7 = vmul.f32 %v174_v6, %v115_v3  ;;  %v184_v10 = vsel %vm183_vm8, %v621_v58, %v180_v5  ;;  %v314_v58 = vld [vmem:[#allocation7 + $0x28] sm:$0xff] }
  0xbd   :  { %v186_v12 = vmul.f32 %v184_v10, %v115_v3  ;;  %337 = vmatpush.msra.mxu2 %v314_v58 }
  0xbe   :  { %v187_v13 = vmul.f32 %v185_v7, %v139_v42  ;;  %v191_v14 = vperm.slane %v185_v7, 0 }
  0xbf   :  { %v188_v15 = vmul.f32 %v186_v12, %v140_v44  ;;  %v192_v21 = vperm.slane %v186_v12, 0  ;;  %338 = vmatpush.msra.mxu2 %v313_v62 }
  0xc0   :  { %v189_v16 = vsub.f32 %v116_v11, %v187_v13  ;;  %v193_v17 = vmul.f32 %v191_v14, %v819_v8 }
  0xc1   :  { %v190_v19 = vsub.f32 %v116_v11, %v188_v15  ;;  %v194_v24 = vmul.f32 %v192_v21, %v821_v9 }
  0xc2   :  { %v195_v18 = vperm.slane %v189_v16, 0  ;;  %v234_v16 = vld [vmem:[#allocation8 + $0x2] sm:$0x1] }
  0xc3   :  { %v196_v23 = vperm.slane %v190_v19, 0 }
  0xc4   :  { %v197_v20 = vadd.f32 %v195_v18, %v193_v17 }
  0xc5   :  { %v198_v25 = vadd.f32 %v196_v23, %v194_v24 }
  0xc6   :  { %v199_v22 = vmax.f32 %v197_v20, 0.0 }
  0xc7   :  { %v200_v26 = vmax.f32 %v198_v25, 0.0 }
  0xc8   :  { %597 = vmatmul.msk.f32.vlgmr.msrb.gmra.mxu1 %vm117_vm1, %v199_v22  ;;  %v235_v22 = vld [vmem:[#allocation8 + $0x3] sm:$0x1] }
  0xd0   :  { %598 = vmatmul.msk.f32.gmra.mxu1 %vm117_vm1, %v200_v26 }
 0x145   :  { %v843_v27 = vpop.f32.mrf.mxu1 }
 0x146   :  { %v236_v28 = vsel %vm117_vm1, %v843_v27, 0.0  ;;  %v252_v8 = vmul.f32 %v843_v27, %v843_v27 }
 0x147   :  { %v237_v29 = vrot.slane %v236_v28, 4 }
 0x148   :  { %v254_v30 = vsel %vm117_vm1, %v252_v8, 0.0 }
 0x149   :  { %v238_v31 = vadd.f32 %v237_v29, %v236_v28  ;;  %v255_v32 = vrot.slane %v254_v30, 4 }
 0x14b   :  { %v239_v9 = vrot.slane %v238_v31, 2  ;;  %v256_v33 = vadd.f32 %v255_v32, %v254_v30 }
 0x14d   :  { %v240_v34 = vadd.f32 %v239_v9, %v238_v31  ;;  %v257_v35 = vrot.slane %v256_v33, 2  ;;  %v850_v37 = vpop.f32.mrf.mxu1 }
 0x14e   :  { %v243_v38 = vsel %vm117_vm1, %v850_v37, 0.0  ;;  %v253_v39 = vmul.f32 %v850_v37, %v850_v37 }
 0x14f   :  { %v241_v40 = vrot.slane %v240_v34, 1  ;;  %v258_v41 = vadd.f32 %v257_v35, %v256_v33  ;;  %v244_v42 = vrot.slane %v243_v38, 4 }
 0x150   :  { %v261_v43 = vsel %vm117_vm1, %v253_v39, 0.0 }
 0x151   :  { %v242_v44 = vadd.f32 %v241_v40, %v240_v34  ;;  %v259_v45 = vrot.slane %v258_v41, 1  ;;  %v245_v46 = vadd.f32 %v244_v42, %v243_v38  ;;  %v262_v47 = vrot.slane %v261_v43, 4 }
 0x153   :  { %v250_v49 = vmul.f32 %v242_v44, %v833_v36  ;;  %v260_v50 = vadd.f32 %v259_v45, %v258_v41  ;;  %v246_v51 = vrot.slane %v245_v46, 2  ;;  %v263_v52 = vadd.f32 %v262_v47, %v261_v43 }
 0x155   :  { %v268_v54 = vmul.f32 %v260_v50, %v833_v36  ;;  %v270_v55 = vmul.f32 %v250_v49, %v250_v49  ;;  %v247_v56 = vadd.f32 %v246_v51, %v245_v46  ;;  %v264_v57 = vrot.slane %v263_v52, 2 }
 0x157   :  { %v272_v59 = vsub.f32 %v268_v54, %v270_v55  ;;  %v248_v60 = vrot.slane %v247_v56, 1  ;;  %v265_v61 = vadd.f32 %v264_v57, %v263_v52 }
 0x159   :  { %v274_v63 = vadd.f32 1e-05, %v272_v59  ;;  %v249_v0 = vadd.f32 %v248_v60, %v247_v56  ;;  %v266_v1 = vrot.slane %v265_v61, 1 }
 0x15b   :  { %622 = vrsqrt.f32 %v274_v63  ;;  %v251_v2 = vmul.f32 %v249_v0, %v833_v36  ;;  %v267_v3 = vadd.f32 %v266_v1, %v265_v61  ;;  %vm282_vm10 = vweird.f32 %v274_v63 }
 0x15d   :  { %v269_v4 = vmul.f32 %v267_v3, %v833_v36  ;;  %v271_v5 = vmul.f32 %v251_v2, %v251_v2 }
 0x15f   :  { %v273_v6 = vsub.f32 %v269_v4, %v271_v5  ;;  %v427_v4 = vld [vmem:[#allocation7 + $0x50] sm:$0xff] }
 0x161   :  { %v623_v7 = vpop.eup %622  ;;  %v275_v10 = vadd.f32 1e-05, %v273_v6 }
 0x162   :  { %v277_v11 = vmul.f32 %v623_v7, %v274_v63  ;;  %vm283_vm9 = vweird.f32 %v623_v7  ;;  %v428_v63 = vld [vmem:[#allocation7 + $0x58] sm:$0xff] }
 0x163   :  { %624 = vrsqrt.f32 %v275_v10  ;;  %vm284_vm11 = vmor %vm282_vm10, %vm283_vm9  ;;  %vm292_vm13 = vweird.f32 %v275_v10  ;;  %447 = vmatpush.msra.mxu3 %v428_v63 }
 0x164   :  { %v278_v12 = vmul.f32 %v623_v7, %v277_v11  ;;  %v426_v11 = vld [vmem:[#allocation7 + $0x48] sm:$0xff] }
 0x165   :  { %448 = vmatpush.msra.mxu3 %v427_v4 }
 0x166   :  { %v279_v13 = vmul.f32 0.5, %v278_v12 }
 0x167   :  { %449 = vmatpush.msra.mxu3 %v426_v11 }
 0x168   :  { %v280_v14 = vsub.f32 1.5, %v279_v13 }
 0x169   :  { %v625_v15 = vpop.eup %624 }
 0x16a   :  { %v281_v17 = vmul.f32 %v623_v7, %v280_v14  ;;  %v287_v18 = vmul.f32 %v625_v15, %v275_v10  ;;  %vm293_vm12 = vweird.f32 %v625_v15 }
 0x16b   :  { %vm294_vm14 = vmor %vm292_vm13, %vm293_vm12 }
 0x16c   :  { %v285_v19 = vsel %vm284_vm11, %v623_v7, %v281_v17  ;;  %v288_v20 = vmul.f32 %v625_v15, %v287_v18 }
 0x16d   :  { %v296_v21 = vmul.f32 %v285_v19, %v234_v16 }
 0x16e   :  { %v289_v23 = vmul.f32 0.5, %v288_v20 }
 0x16f   :  { %v302_v24 = vperm.slane %v296_v21, 0  ;;  %v298_v25 = vmul.f32 %v296_v21, %v250_v49 }
 0x170   :  { %v290_v26 = vsub.f32 1.5, %v289_v23 }
 0x171   :  { %v300_v28 = vsub.f32 %v235_v22, %v298_v25  ;;  %v304_v29 = vmul.f32 %v302_v24, %v843_v27 }
 0x172   :  { %v291_v8 = vmul.f32 %v625_v15, %v290_v26 }
 0x173   :  { %v306_v30 = vperm.slane %v300_v28, 0 }
 0x174   :  { %v295_v31 = vsel %vm294_vm14, %v625_v15, %v291_v8  ;;  %v425_v15 = vld [vmem:[#allocation7 + $0x40] sm:$0xff] }
 0x175   :  { %v297_v32 = vmul.f32 %v295_v31, %v234_v16  ;;  %v308_v9 = vadd.f32 %v306_v30, %v304_v29  ;;  %450 = vmatpush.msra.mxu3 %v425_v15  ;;  %v346_v31 = vld [vmem:[#allocation8 + $0x4] sm:$0x1] }
 0x177   :  { %v299_v33 = vmul.f32 %v297_v32, %v251_v2  ;;  %v303_v34 = vperm.slane %v297_v32, 0  ;;  %v310_v35 = vmax.f32 %v308_v9, 0.0 }
 0x179   :  { %v301_v38 = vsub.f32 %v235_v22, %v299_v33  ;;  %599 = vmatmul.msk.f32.vlgmr.msra.gmra.mxu2 %vm117_vm1, %v310_v35  ;;  %v305_v39 = vmul.f32 %v303_v34, %v850_v37 }
 0x17b   :  { %v307_v40 = vperm.slane %v301_v38, 0  ;;  %v347_v38 = vld [vmem:[#allocation8 + $0x5] sm:$0x1] }
 0x17d   :  { %v309_v41 = vadd.f32 %v307_v40, %v305_v39 }
 0x17f   :  { %v311_v42 = vmax.f32 %v309_v41, 0.0 }
 0x181   :  { %600 = vmatmul.msk.f32.gmra.mxu2 %vm117_vm1, %v311_v42 }
 0x1fc   :  { %v865_v43 = vpop.f32.mrf.mxu2 }
 0x1fd   :  { %v348_v27 = vsel %vm117_vm1, %v865_v43, 0.0  ;;  %v364_v44 = vmul.f32 %v865_v43, %v865_v43 }
 0x1fe   :  { %v349_v45 = vrot.slane %v348_v27, 4 }
 0x1ff   :  { %v366_v46 = vsel %vm117_vm1, %v364_v44, 0.0 }
 0x200   :  { %v350_v47 = vadd.f32 %v349_v45, %v348_v27  ;;  %v367_v48 = vrot.slane %v366_v46, 4 }
 0x202   :  { %v351_v49 = vrot.slane %v350_v47, 2  ;;  %v368_v37 = vadd.f32 %v367_v48, %v366_v46 }
 0x204   :  { %v352_v50 = vadd.f32 %v351_v49, %v350_v47  ;;  %v369_v51 = vrot.slane %v368_v37, 2  ;;  %v872_v52 = vpop.f32.mrf.mxu2 }
 0x205   :  { %v355_v53 = vsel %vm117_vm1, %v872_v52, 0.0  ;;  %v365_v54 = vmul.f32 %v872_v52, %v872_v52 }
 0x206   :  { %v353_v55 = vrot.slane %v352_v50, 1  ;;  %v370_v56 = vadd.f32 %v369_v51, %v368_v37  ;;  %v356_v57 = vrot.slane %v355_v53, 4 }
 0x207   :  { %v373_v58 = vsel %vm117_vm1, %v365_v54, 0.0 }
 0x208   :  { %v354_v59 = vadd.f32 %v353_v55, %v352_v50  ;;  %v371_v60 = vrot.slane %v370_v56, 1  ;;  %v357_v61 = vadd.f32 %v356_v57, %v355_v53  ;;  %v374_v62 = vrot.slane %v373_v58, 4 }
 0x20a   :  { %v362_v0 = vmul.f32 %v354_v59, %v833_v36  ;;  %v372_v1 = vadd.f32 %v371_v60, %v370_v56  ;;  %v358_v2 = vrot.slane %v357_v61, 2  ;;  %v375_v3 = vadd.f32 %v374_v62, %v373_v58 }
 0x20c   :  { %v380_v5 = vmul.f32 %v372_v1, %v833_v36  ;;  %v382_v6 = vmul.f32 %v362_v0, %v362_v0  ;;  %v359_v7 = vadd.f32 %v358_v2, %v357_v61  ;;  %v376_v10 = vrot.slane %v375_v3, 2 }
 0x20e   :  { %v384_v12 = vsub.f32 %v380_v5, %v382_v6  ;;  %v360_v13 = vrot.slane %v359_v7, 1  ;;  %v377_v14 = vadd.f32 %v376_v10, %v375_v3 }
 0x210   :  { %v386_v16 = vadd.f32 1e-05, %v384_v12  ;;  %v361_v17 = vadd.f32 %v360_v13, %v359_v7  ;;  %v378_v18 = vrot.slane %v377_v14, 1 }
 0x212   :  { %626 = vrsqrt.f32 %v386_v16  ;;  %v363_v19 = vmul.f32 %v361_v17, %v833_v36  ;;  %v379_v20 = vadd.f32 %v378_v18, %v377_v14  ;;  %vm394_vm0 = vweird.f32 %v386_v16 }
 0x214   :  { %v381_v21 = vmul.f32 %v379_v20, %v833_v36  ;;  %v383_v22 = vmul.f32 %v363_v19, %v363_v19 }
 0x216   :  { %v385_v23 = vsub.f32 %v381_v21, %v383_v22  ;;  %v539_v21 = vld [vmem:[#allocation7 + $0x70] sm:$0xff] }
 0x218   :  { %v627_v24 = vpop.eup %626  ;;  %v387_v25 = vadd.f32 1e-05, %v385_v23 }
 0x219   :  { %v389_v26 = vmul.f32 %v627_v24, %v386_v16  ;;  %vm395_vm15 = vweird.f32 %v627_v24  ;;  %v540_v16 = vld [vmem:[#allocation7 + $0x78] sm:$0xff] }
 0x21a   :  { %628 = vrsqrt.f32 %v387_v25  ;;  %vm396_vm2 = vmor %vm394_vm0, %vm395_vm15  ;;  %vm404_vm4 = vweird.f32 %v387_v25  ;;  %561 = vmatpush.msrb.mxu0 %v540_v16 }
 0x21b   :  { %v390_v28 = vmul.f32 %v627_v24, %v389_v26  ;;  %v538_v26 = vld [vmem:[#allocation7 + $0x68] sm:$0xff] }
 0x21c   :  { %562 = vmatpush.msrb.mxu0 %v539_v21 }
 0x21d   :  { %v391_v8 = vmul.f32 0.5, %v390_v28 }
 0x21e   :  { %563 = vmatpush.msrb.mxu0 %v538_v26 }
 0x21f   :  { %v392_v29 = vsub.f32 1.5, %v391_v8 }
 0x220   :  { %v629_v30 = vpop.eup %628 }
 0x221   :  { %v393_v32 = vmul.f32 %v627_v24, %v392_v29  ;;  %v399_v9 = vmul.f32 %v629_v30, %v387_v25  ;;  %vm405_vm3 = vweird.f32 %v629_v30 }
 0x222   :  { %vm406_vm5 = vmor %vm404_vm4, %vm405_vm3 }
 0x223   :  { %v397_v33 = vsel %vm396_vm2, %v627_v24, %v393_v32  ;;  %v400_v34 = vmul.f32 %v629_v30, %v399_v9 }
 0x224   :  { %v408_v35 = vmul.f32 %v397_v33, %v346_v31 }
 0x225   :  { %v401_v39 = vmul.f32 0.5, %v400_v34 }
 0x226   :  { %v414_v40 = vperm.slane %v408_v35, 0  ;;  %v410_v41 = vmul.f32 %v408_v35, %v362_v0 }
 0x227   :  { %v402_v42 = vsub.f32 1.5, %v401_v39 }
 0x228   :  { %v412_v27 = vsub.f32 %v347_v38, %v410_v41  ;;  %v416_v45 = vmul.f32 %v414_v40, %v865_v43 }
 0x229   :  { %v403_v44 = vmul.f32 %v629_v30, %v402_v42 }
 0x22a   :  { %v418_v46 = vperm.slane %v412_v27, 0 }
 0x22b   :  { %v407_v47 = vsel %vm406_vm5, %v629_v30, %v403_v44  ;;  %v537_v30 = vld [vmem:[#allocation7 + $0x60] sm:$0xff] }
 0x22c   :  { %v409_v48 = vmul.f32 %v407_v47, %v346_v31  ;;  %v420_v49 = vadd.f32 %v418_v46, %v416_v45  ;;  %564 = vmatpush.msrb.mxu0 %v537_v30  ;;  %v458_v47 = vld [vmem:[#allocation8 + $0x6] sm:$0x1] }
 0x22e   :  { %v411_v37 = vmul.f32 %v409_v48, %v363_v19  ;;  %v415_v50 = vperm.slane %v409_v48, 0  ;;  %v422_v51 = vmax.f32 %v420_v49, 0.0 }
 0x230   :  { %v413_v53 = vsub.f32 %v347_v38, %v411_v37  ;;  %601 = vmatmul.msk.f32.vlgmr.msra.gmra.mxu3 %vm117_vm1, %v422_v51  ;;  %v417_v54 = vmul.f32 %v415_v50, %v872_v52 }
 0x232   :  { %v419_v55 = vperm.slane %v413_v53, 0 }
 0x234   :  { %v421_v56 = vadd.f32 %v419_v55, %v417_v54 }
 0x236   :  { %v423_v57 = vmax.f32 %v421_v56, 0.0 }
 0x238   :  { %602 = vmatmul.msk.f32.gmra.mxu3 %vm117_vm1, %v423_v57 }
 0x2b3   :  { %v887_v58 = vpop.f32.mrf.mxu3 }
 0x2b4   :  { %v460_v43 = vsel %vm117_vm1, %v887_v58, 0.0  ;;  %v476_v59 = vmul.f32 %v887_v58, %v887_v58 }
 0x2b5   :  { %v461_v60 = vrot.slane %v460_v43, 4 }
 0x2b6   :  { %v478_v61 = vsel %vm117_vm1, %v476_v59, 0.0 }
 0x2b7   :  { %v462_v62 = vadd.f32 %v461_v60, %v460_v43  ;;  %v479_v63 = vrot.slane %v478_v61, 4 }
 0x2b9   :  { %v463_v0 = vrot.slane %v462_v62, 2  ;;  %v480_v52 = vadd.f32 %v479_v63, %v478_v61 }
 0x2bb   :  { %v464_v1 = vadd.f32 %v463_v0, %v462_v62  ;;  %v481_v2 = vrot.slane %v480_v52, 2  ;;  %v894_v3 = vpop.f32.mrf.mxu3 }
 0x2bc   :  { %v467_v4 = vsel %vm117_vm1, %v894_v3, 0.0  ;;  %v477_v5 = vmul.f32 %v894_v3, %v894_v3 }
 0x2bd   :  { %v465_v6 = vrot.slane %v464_v1, 1  ;;  %v482_v7 = vadd.f32 %v481_v2, %v480_v52  ;;  %v468_v10 = vrot.slane %v467_v4, 4 }
 0x2be   :  { %v485_v11 = vsel %vm117_vm1, %v477_v5, 0.0 }
 0x2bf   :  { %v466_v12 = vadd.f32 %v465_v6, %v464_v1  ;;  %v483_v13 = vrot.slane %v482_v7, 1  ;;  %v469_v14 = vadd.f32 %v468_v10, %v467_v4  ;;  %v486_v15 = vrot.slane %v485_v11, 4  ;;  %v615_v10 = vld [vmem:[#allocation8 + $0x8] ss:$0 sm:$0xff] }
 0x2c1   :  { %v474_v17 = vmul.f32 %v466_v12, %v833_v36  ;;  %v484_v18 = vadd.f32 %v483_v13, %v482_v7  ;;  %v470_v19 = vrot.slane %v469_v14, 2  ;;  %v487_v20 = vadd.f32 %v486_v15, %v485_v11 }
 0x2c3   :  { %v492_v22 = vmul.f32 %v484_v18, %v833_v36  ;;  %v494_v23 = vmul.f32 %v474_v17, %v474_v17  ;;  %v471_v24 = vadd.f32 %v470_v19, %v469_v14  ;;  %v488_v25 = vrot.slane %v487_v20, 2 }
 0x2c5   :  { %v496_v28 = vsub.f32 %v492_v22, %v494_v23  ;;  %v472_v8 = vrot.slane %v471_v24, 1  ;;  %v489_v29 = vadd.f32 %v488_v25, %v487_v20 }
 0x2c7   :  { %v498_v31 = vadd.f32 1e-05, %v496_v28  ;;  %v473_v32 = vadd.f32 %v472_v8, %v471_v24  ;;  %v490_v9 = vrot.slane %v489_v29, 1 }
 0x2c9   :  { %630 = vrsqrt.f32 %v498_v31  ;;  %v475_v33 = vmul.f32 %v473_v32, %v833_v36  ;;  %v491_v34 = vadd.f32 %v490_v9, %v489_v29  ;;  %vm506_vm7 = vweird.f32 %v498_v31 }
 0x2cb   :  { %v493_v35 = vmul.f32 %v491_v34, %v833_v36  ;;  %v495_v38 = vmul.f32 %v475_v33, %v475_v33  ;;  %v459_v36 = vld [vmem:[#allocation8 + $0x7] sm:$0x1] }
 0x2cd   :  { %v497_v39 = vsub.f32 %v493_v35, %v495_v38 }
 0x2cf   :  { %v631_v40 = vpop.eup %630  ;;  %v499_v41 = vadd.f32 1e-05, %v497_v39 }
 0x2d0   :  { %v501_v42 = vmul.f32 %v631_v40, %v498_v31  ;;  %vm507_vm6 = vweird.f32 %v631_v40 }
 0x2d1   :  { %632 = vrsqrt.f32 %v499_v41  ;;  %vm508_vm8 = vmor %vm506_vm7, %vm507_vm6  ;;  %vm516_vm10 = vweird.f32 %v499_v41 }
 0x2d2   :  { %v502_v27 = vmul.f32 %v631_v40, %v501_v42 }
 0x2d4   :  { %v503_v44 = vmul.f32 0.5, %v502_v27 }
 0x2d6   :  { %v504_v45 = vsub.f32 1.5, %v503_v44 }
 0x2d7   :  { %v633_v46 = vpop.eup %632 }
 0x2d8   :  { %v505_v48 = vmul.f32 %v631_v40, %v504_v45  ;;  %v511_v49 = vmul.f32 %v633_v46, %v499_v41  ;;  %vm517_vm9 = vweird.f32 %v633_v46 }
 0x2d9   :  { %vm518_vm11 = vmor %vm516_vm10, %vm517_vm9 }
 0x2da   :  { %v509_v37 = vsel %vm508_vm8, %v631_v40, %v505_v48  ;;  %v512_v50 = vmul.f32 %v633_v46, %v511_v49 }
 0x2db   :  { %v520_v51 = vmul.f32 %v509_v37, %v458_v47 }
 0x2dc   :  { %v513_v53 = vmul.f32 0.5, %v512_v50 }
 0x2dd   :  { %v522_v54 = vmul.f32 %v520_v51, %v474_v17  ;;  %v526_v55 = vperm.slane %v520_v51, 0 }
 0x2de   :  { %v514_v56 = vsub.f32 1.5, %v513_v53 }
 0x2df   :  { %v524_v57 = vsub.f32 %v459_v36, %v522_v54  ;;  %v528_v59 = vmul.f32 %v526_v55, %v887_v58 }
 0x2e0   :  { %v515_v43 = vmul.f32 %v633_v46, %v514_v56 }
 0x2e1   :  { %v530_v60 = vperm.slane %v524_v57, 0 }
 0x2e2   :  { %v519_v61 = vsel %vm518_vm11, %v633_v46, %v515_v43 }
 0x2e3   :  { %v532_v62 = vadd.f32 %v530_v60, %v528_v59  ;;  %v521_v63 = vmul.f32 %v519_v61, %v458_v47 }
 0x2e5   :  { %v534_v0 = vmax.f32 %v532_v62, 0.0  ;;  %v523_v52 = vmul.f32 %v521_v63, %v475_v33  ;;  %v527_v1 = vperm.slane %v521_v63, 0 }
 0x2e7   :  { %v525_v2 = vsub.f32 %v459_v36, %v523_v52  ;;  %603 = vmatmul.msk.f32.vlgmr.msrb.gmra.mxu0 %vm117_vm1, %v534_v0  ;;  %v529_v4 = vmul.f32 %v527_v1, %v894_v3 }
 0x2e9   :  { %v531_v5 = vperm.slane %v525_v2, 0 }
 0x2eb   :  { %v533_v6 = vadd.f32 %v531_v5, %v529_v4 }
 0x2ed   :  { %v535_v7 = vmax.f32 %v533_v6, 0.0 }
 0x2ef   :  { %604 = vmatmul.msk.f32.gmra.mxu0 %vm117_vm1, %v535_v7 }
 0x364   :  { %v566_v58 = vpop.f32.mrf.mxu0 }
 0x365   :  { %v567_v11 = vadd.f32 %v615_v10, %v566_v58 }
 0x367   :  { %572 = vst.msk [vmem:[#allocation10] sm:$0xff] %vm117_vm1, %v567_v11 }
 0x36c   :  { %v569_v12 = vpop.f32.mrf.mxu0 }
 0x36d   :  { %v570_v13 = vadd.f32 %v615_v10, %v569_v12 }
 0x36f   :  { %573 = vst.msk [vmem:[#allocation10 + $0x8] sm:$0xff] %vm117_vm1, %v570_v13 }
 0x370   :  { %586 = dma.vmem_to_hbm [thread:$0]  %s579_s8, 256, %s581_s11, [#allocation4], %s763_s23, %s763_s23, %s764_s24  }
 0x371   :  { %760 = dma.done.wait [#allocation4], 256  }
 0x372   :  { %761 = vsyncadd [#allocation4], 4294967040 }
 0x373   :  { %591 = vsyncpa [#allocation3], 1 }
 0x374   :  { %592 = vsyncpa [#allocation6], 1 }
 0x375   :  { %593 = vsyncpa [#allocation9], 1 }
 0x376   :  { %594 = vsyncpa [#allocation4], 1 }

</bundles_post_ra>
